<compile_context>
chip_gen: v7x
topology: tpu7x:2x2x1
jax: 0.10.0
libtpu: 0.0.40
codegen_flags: <defaults>
</compile_context>

<pallas_src>
import functools

import jax
import jax.numpy as jnp
import numpy as np
from jax.experimental import pallas as pl
from jax.experimental.pallas import tpu as pltpu

BCE_SMOOTH = 1e-8          # WeightedBCELoss smooth
DICE_SMOOTH = 1e-6         # BinaryDiceLoss smooth
POS_WEIGHT = (1.0, 1.0)    # WeightedBCELoss pos_weight
LOSS_WEIGHT = (1.0, 1.0)   # BCE_DiceLoss loss_weight

LANES = 128
SUBLANES = 8


def _round_up(x, m):
    return ((x + m - 1) // m) * m


def _bce_dice_kernel(pred_ref, tgt_ref, out_ref,
                     bce_acc, inter_acc, pow_acc, *,
                     total_feats, rows, block_rows, binary_targets, needs_mask):
    k = pl.program_id(1)

    @pl.when(k == 0)
    def _init():
        bce_acc[...] = jnp.zeros_like(bce_acc)
        inter_acc[...] = jnp.zeros_like(inter_acc)
        pow_acc[...] = jnp.zeros_like(pow_acc)

    p = pred_ref[...].astype(jnp.float32)     # (bs, block_rows, 128)
    t = tgt_ref[...].astype(jnp.float32)

    if needs_mask:
        # Rows beyond the true per-sample feature extent come from Pallas'
        # partial edge blocks and hold unspecified data; zero them before any
        # accumulation (p = t = 0 contributes exactly 0 to all three sums).
        row_id = jax.lax.broadcasted_iota(jnp.int32, p.shape, 1) + k * block_rows
        valid = row_id < rows
        p = jnp.where(valid, p, 0.0)
        t = jnp.where(valid, t, 0.0)

    # WeightedBCELoss log terms.  Negation and /sum(pos_weight) are folded into
    # the finalize scalars.  NOTE: like the PyTorch reference, predictions are
    # only clamped from below (p must be <= 1 to avoid log of a negative).
    pc = jnp.maximum(p, BCE_SMOOTH)
    w0, w1 = POS_WEIGHT
    if binary_targets and w0 == 1.0 and w1 == 1.0:
        # Hard {0,1} targets: only one log term is live per element -> a single
        # EUP log push per element; also t*t == t for the dice denominator.
        bce = jnp.log(jnp.where(t != 0.0, pc, 1.0 - pc) + BCE_SMOOTH)
        pw_elem = p * p + t
    else:
        log_p = jnp.log(pc + BCE_SMOOTH)
        log_1p = jnp.log(1.0 - pc + BCE_SMOOTH)
        if w0 == 1.0 and w1 == 1.0:
            bce = t * log_p + (1.0 - t) * log_1p
        else:
            bce = w0 * t * log_p + w1 * (1.0 - t) * log_1p
        pw_elem = p * p + t * t

    bs = p.shape[0]

    def lane_partial(x):
        # (bs, block_rows, 128) -> (bs, block_rows//8, 8, 128); reducing axis 1
        # is pure vector adds (no per-step cross-lane XLU reduction).
        return jnp.sum(
            x.reshape(bs, block_rows // SUBLANES, SUBLANES, LANES), axis=1)

    bce_acc[...] += lane_partial(bce)
    inter_acc[...] += lane_partial(p * t)
    pow_acc[...] += lane_partial(pw_elem)

    @pl.when(k == pl.num_programs(1) - 1)
    def _finalize():
        def per_sample_sum(a):                      # (bs, 8, 128) -> (bs, 1, 1)
            return jnp.sum(jnp.sum(a, axis=2, keepdims=True),
                           axis=1, keepdims=True)

        w_sum = POS_WEIGHT[0] + POS_WEIGHT[1]
        bce_sum = per_sample_sum(bce_acc[...])
        inter = per_sample_sum(inter_acc[...])
        pw = per_sample_sum(pow_acc[...])
        bce_mean = -bce_sum / jnp.float32(w_sum * total_feats)
        dice = 1.0 - (2.0 * inter + DICE_SMOOTH) / (pw + DICE_SMOOTH)
        lw0, lw1 = LOSS_WEIGHT
        loss = (lw0 * bce_mean + lw1 * dice) / (lw0 + lw1)   # (bs, 1, 1)
        out_ref[...] = jnp.broadcast_to(loss, out_ref.shape)


def bce_dice_loss(predict, target, *, tile_rows=2048, assume_binary_targets=True):
    """predict/target: (N, C, H, W) (any matching shape). Returns (N,) f32.

    assume_binary_targets=True enables the single-log fast path (valid only for
    exactly-{0,1} targets); set False for soft labels.
    """
    assert predict.shape == target.shape
    n = predict.shape[0]
    f = int(np.prod(predict.shape[1:]))

    # Keep native input dtype; the kernel casts each tile to f32.
    pred2d = predict.reshape(n, f)
    tgt2d = target.reshape(n, f)

    # Lane-pad only (to a multiple of 128) when the feature count requires it;
    # the zeros contribute exactly 0 to all sums and the BCE mean divides by
    # the true f.  Row-level padding is handled in-kernel by masking.
    # TODO(synk): the f % 128 != 0 case still materializes one padded HBM copy.
    f_pad = _round_up(f, LANES)
    if f_pad != f:
        pred2d = jnp.pad(pred2d, ((0, 0), (0, f_pad - f)))
        tgt2d = jnp.pad(tgt2d, ((0, 0), (0, f_pad - f)))
    rows = f_pad // LANES
    pred3d = pred2d.reshape(n, rows, LANES)
    tgt3d = tgt2d.reshape(n, rows, LANES)

    # Tile selection: feature tiles of `tr` rows (multiple of 8).  When one
    # sample fits in a single tile, pack several samples per block to amortize
    # the fixed per-grid-step overhead.
    tile_rows = max(SUBLANES, _round_up(tile_rows, SUBLANES))
    tr = min(tile_rows, _round_up(rows, SUBLANES))
    nk = pl.cdiv(rows, tr)
    bs = max(1, min(n, tile_rows // tr)) if nk == 1 else 1
    nb = pl.cdiv(n, bs)
    needs_mask = (nk * tr != rows)

    kernel = functools.partial(
        _bce_dice_kernel,
        total_feats=f, rows=rows, block_rows=tr,
        binary_targets=assume_binary_targets, needs_mask=needs_mask)

    out = pl.pallas_call(
        kernel,
        out_shape=jax.ShapeDtypeStruct((n, SUBLANES, LANES), jnp.float32),
        grid_spec=pltpu.PrefetchScalarGridSpec(
            num_scalar_prefetch=0,
            grid=(nb, nk),
            in_specs=[
                pl.BlockSpec((bs, tr, LANES), lambda b, k: (b, k, 0)),
                pl.BlockSpec((bs, tr, LANES), lambda b, k: (b, k, 0)),
            ],
            out_specs=pl.BlockSpec((bs, SUBLANES, LANES),
                                   lambda b, k: (b, 0, 0)),
            scratch_shapes=[
                pltpu.VMEM((bs, SUBLANES, LANES), jnp.float32),  # bce log sum
                pltpu.VMEM((bs, SUBLANES, LANES), jnp.float32),  # sum(p*t)
                pltpu.VMEM((bs, SUBLANES, LANES), jnp.float32),  # sum(p^2+t^2)
            ],
        ),
        compiler_params=pltpu.CompilerParams(
            # Batch axis shardable across v7x's two TensorCores; feature axis
            # is the sequential reduction.
            dimension_semantics=("parallel", "arbitrary"),
            # Headroom so double-buffering of 1 MiB tiles survives v5e's 16 MiB
            # scoped default; well inside v7x's 64 MiB physical VMEM.
            vmem_limit_bytes=32 * 1024 * 1024),
    )(pred3d, tgt3d)
    return out[:, 0, 0]


def _reference(predict, target):
    n = predict.shape[0]
    p = predict.reshape(n, -1).astype(jnp.float32)
    t = target.reshape(n, -1).astype(jnp.float32)
    pc = jnp.maximum(p, BCE_SMOOTH)
    w0, w1 = POS_WEIGHT
    bce = -(w0 * t * jnp.log(pc + BCE_SMOOTH)
            + w1 * (1.0 - t) * jnp.log(1.0 - pc + BCE_SMOOTH)) / (w0 + w1)
    bce = bce.mean(axis=1)
    num = 2.0 * jnp.sum(p * t, axis=1) + DICE_SMOOTH
    den = jnp.sum(p * p + t * t, axis=1) + DICE_SMOOTH
    dice = 1.0 - num / den
    lw0, lw1 = LOSS_WEIGHT
    return (lw0 * bce + lw1 * dice) / (lw0 + lw1)


if __name__ == "__main__":
    key = jax.random.PRNGKey(0)
    k1, k2, k3, k4, k5 = jax.random.split(key, 5)

    # 1) Main config: binary targets, fast single-log path, batch-packed block.
    N, C, H, W = 2, 4, 16, 16
    predict = jax.random.uniform(k1, (N, C, H, W), dtype=jnp.float32,
                                 minval=1e-4, maxval=1.0 - 1e-4)
    target = (jax.random.uniform(k2, (N, C, H, W)) > 0.5).astype(jnp.float32)
    loss = jax.block_until_ready(bce_dice_loss(predict, target))
    ref = jax.block_until_ready(_reference(predict, target))
    np.testing.assert_allclose(np.asarray(loss), np.asarray(ref),
                               rtol=1e-5, atol=1e-6)

    # 2) Soft labels -> general two-log path.
    soft_t = jax.random.uniform(k3, (N, C, H, W), dtype=jnp.float32)
    loss2 = jax.block_until_ready(
        bce_dice_loss(predict, soft_t, assume_binary_targets=False))
    ref2 = jax.block_until_ready(_reference(predict, soft_t))
    np.testing.assert_allclose(np.asarray(loss2), np.asarray(ref2),
                               rtol=1e-5, atol=1e-6)

    # 3) Unaligned feature count -> lane pad + in-kernel edge-row masking.
    p3 = jax.random.uniform(k4, (3, 3, 20, 20), dtype=jnp.float32,
                            minval=1e-4, maxval=1.0 - 1e-4)
    t3 = (jax.random.uniform(k5, (3, 3, 20, 20)) > 0.5).astype(jnp.float32)
    loss3 = jax.block_until_ready(bce_dice_loss(p3, t3))
    ref3 = jax.block_until_ready(_reference(p3, t3))
    np.testing.assert_allclose(np.asarray(loss3), np.asarray(ref3),
                               rtol=1e-5, atol=1e-6)

    # 4) Multi-tile feature reduction path (small tile override).
    p4 = jax.random.uniform(k1, (2, 4, 32, 32), dtype=jnp.float32,
                            minval=1e-4, maxval=1.0 - 1e-4)
    t4 = (jax.random.uniform(k2, (2, 4, 32, 32)) > 0.5).astype(jnp.float32)
    loss4 = jax.block_until_ready(bce_dice_loss(p4, t4, tile_rows=8))
    ref4 = jax.block_until_ready(_reference(p4, t4))
    np.testing.assert_allclose(np.asarray(loss4), np.asarray(ref4),
                               rtol=1e-5, atol=1e-6)

    print("KERNEL_OK")
</pallas_src>

<mosaic_0001>
module attributes {stable_mosaic.version = 11 : i64} {
  func.func @_bce_dice_kernel(%arg0: i32, %arg1: i32, %arg2: memref<2x8x128xf32, #tpu.memory_space<vmem>>, %arg3: memref<2x8x128xf32, #tpu.memory_space<vmem>>, %arg4: memref<2x8x128xf32, #tpu.memory_space<vmem>>, %arg5: memref<2x8x128xf32, #tpu.memory_space<vmem>>, %arg6: memref<2x8x128xf32, #tpu.memory_space<vmem>>, %arg7: memref<2x8x128xf32, #tpu.memory_space<vmem>>) attributes {dimension_semantics = [#tpu.dimension_semantics<parallel>, #tpu.dimension_semantics<arbitrary>], iteration_bounds = array<i64: 1, 1>, scalar_prefetch = 0 : i64, scratch_operands = 3 : i64, tpu.core_type = #tpu.core_type<tc>, window_params = [{transform_indices = @transform_0, window_bounds = array<i64: 2, 8, 128>}, {transform_indices = @transform_1, window_bounds = array<i64: 2, 8, 128>}, {transform_indices = @transform_2, window_bounds = array<i64: 2, 8, 128>}]} {
    %c0_i32 = arith.constant 0 : i32
    %0 = arith.cmpi eq, %arg1, %c0_i32 : i32
    %1 = arith.extui %0 : i1 to i32
    %c0_i32_0 = arith.constant 0 : i32
    %2 = arith.cmpi ne, %1, %c0_i32_0 : i32
    scf.if %2 {
      %cst_32 = arith.constant 0.000000e+00 : f32
      %36 = vector.broadcast %cst_32 : f32 to vector<2x8x128xf32>
      %c0_33 = arith.constant 0 : index
      %c0_34 = arith.constant 0 : index
      %c0_35 = arith.constant 0 : index
      %37 = vector.load %arg5[%c0_33, %c0_34, %c0_35] : memref<2x8x128xf32, #tpu.memory_space<vmem>>, vector<2x8x128xf32>
      tpu.vector_store %arg5[%c0_33, %c0_34, %c0_35], %36 {strides = array<i32>} : memref<2x8x128xf32, #tpu.memory_space<vmem>>, vector<2x8x128xf32>,
      %cst_36 = arith.constant 0.000000e+00 : f32
      %38 = vector.broadcast %cst_36 : f32 to vector<2x8x128xf32>
      %c0_37 = arith.constant 0 : index
      %c0_38 = arith.constant 0 : index
      %c0_39 = arith.constant 0 : index
      %39 = vector.load %arg6[%c0_37, %c0_38, %c0_39] : memref<2x8x128xf32, #tpu.memory_space<vmem>>, vector<2x8x128xf32>
      tpu.vector_store %arg6[%c0_37, %c0_38, %c0_39], %38 {strides = array<i32>} : memref<2x8x128xf32, #tpu.memory_space<vmem>>, vector<2x8x128xf32>,
      %cst_40 = arith.constant 0.000000e+00 : f32
      %40 = vector.broadcast %cst_40 : f32 to vector<2x8x128xf32>
      %c0_41 = arith.constant 0 : index
      %c0_42 = arith.constant 0 : index
      %c0_43 = arith.constant 0 : index
      %41 = vector.load %arg7[%c0_41, %c0_42, %c0_43] : memref<2x8x128xf32, #tpu.memory_space<vmem>>, vector<2x8x128xf32>
      tpu.vector_store %arg7[%c0_41, %c0_42, %c0_43], %40 {strides = array<i32>} : memref<2x8x128xf32, #tpu.memory_space<vmem>>, vector<2x8x128xf32>,
    } else {
    }
    %c0 = arith.constant 0 : index
    %c0_1 = arith.constant 0 : index
    %c0_2 = arith.constant 0 : index
    %3 = vector.load %arg2[%c0, %c0_1, %c0_2] : memref<2x8x128xf32, #tpu.memory_space<vmem>>, vector<2x8x128xf32>
    %c0_3 = arith.constant 0 : index
    %c0_4 = arith.constant 0 : index
    %c0_5 = arith.constant 0 : index
    %4 = vector.load %arg3[%c0_3, %c0_4, %c0_5] : memref<2x8x128xf32, #tpu.memory_space<vmem>>, vector<2x8x128xf32>
    %cst = arith.constant 9.99999993E-9 : f32
    %5 = vector.broadcast %cst : f32 to vector<2x8x128xf32>
    %6 = arith.maximumf %3, %5 : vector<2x8x128xf32>
    %cst_6 = arith.constant 0.000000e+00 : f32
    %7 = vector.broadcast %cst_6 : f32 to vector<2x8x128xf32>
    %8 = arith.cmpf one, %4, %7 : vector<2x8x128xf32>
    %cst_7 = arith.constant 1.000000e+00 : f32
    %9 = vector.broadcast %cst_7 : f32 to vector<2x8x128xf32>
    %10 = arith.subf %9, %6 : vector<2x8x128xf32>
    %11 = arith.select %8, %6, %10 : vector<2x8x128xi1>, vector<2x8x128xf32>
    %cst_8 = arith.constant 9.99999993E-9 : f32
    %12 = vector.broadcast %cst_8 : f32 to vector<2x8x128xf32>
    %13 = arith.addf %11, %12 : vector<2x8x128xf32>
    %14 = math.log %13 : vector<2x8x128xf32>
    %15 = arith.mulf %3, %3 : vector<2x8x128xf32>
    %16 = arith.addf %15, %4 : vector<2x8x128xf32>
    %c0_9 = arith.constant 0 : index
    %c0_10 = arith.constant 0 : index
    %c0_11 = arith.constant 0 : index
    %17 = vector.load %arg5[%c0_9, %c0_10, %c0_11] : memref<2x8x128xf32, #tpu.memory_space<vmem>>, vector<2x8x128xf32>
    %18 = vector.shape_cast %14 : vector<2x8x128xf32> to vector<2x1x8x128xf32>
    %cst_12 = arith.constant dense<0.000000e+00> : vector<2x8x128xf32>
    %19 = vector.multi_reduction <add>, %18, %cst_12 [1] : vector<2x1x8x128xf32> to vector<2x8x128xf32>
    %20 = arith.addf %17, %19 : vector<2x8x128xf32>
    %c0_13 = arith.constant 0 : index
    %c0_14 = arith.constant 0 : index
    %c0_15 = arith.constant 0 : index
    %21 = vector.load %arg5[%c0_13, %c0_14, %c0_15] : memref<2x8x128xf32, #tpu.memory_space<vmem>>, vector<2x8x128xf32>
    tpu.vector_store %arg5[%c0_13, %c0_14, %c0_15], %20 {strides = array<i32>} : memref<2x8x128xf32, #tpu.memory_space<vmem>>, vector<2x8x128xf32>,
    %c0_16 = arith.constant 0 : index
    %c0_17 = arith.constant 0 : index
    %c0_18 = arith.constant 0 : index
    %22 = vector.load %arg6[%c0_16, %c0_17, %c0_18] : memref<2x8x128xf32, #tpu.memory_space<vmem>>, vector<2x8x128xf32>
    %23 = arith.mulf %3, %4 : vector<2x8x128xf32>
    %24 = vector.shape_cast %23 : vector<2x8x128xf32> to vector<2x1x8x128xf32>
    %cst_19 = arith.constant dense<0.000000e+00> : vector<2x8x128xf32>
    %25 = vector.multi_reduction <add>, %24, %cst_19 [1] : vector<2x1x8x128xf32> to vector<2x8x128xf32>
    %26 = arith.addf %22, %25 : vector<2x8x128xf32>
    %c0_20 = arith.constant 0 : index
    %c0_21 = arith.constant 0 : index
    %c0_22 = arith.constant 0 : index
    %27 = vector.load %arg6[%c0_20, %c0_21, %c0_22] : memref<2x8x128xf32, #tpu.memory_space<vmem>>, vector<2x8x128xf32>
    tpu.vector_store %arg6[%c0_20, %c0_21, %c0_22], %26 {strides = array<i32>} : memref<2x8x128xf32, #tpu.memory_space<vmem>>, vector<2x8x128xf32>,
    %c0_23 = arith.constant 0 : index
    %c0_24 = arith.constant 0 : index
    %c0_25 = arith.constant 0 : index
    %28 = vector.load %arg7[%c0_23, %c0_24, %c0_25] : memref<2x8x128xf32, #tpu.memory_space<vmem>>, vector<2x8x128xf32>
    %29 = vector.shape_cast %16 : vector<2x8x128xf32> to vector<2x1x8x128xf32>
    %cst_26 = arith.constant dense<0.000000e+00> : vector<2x8x128xf32>
    %30 = vector.multi_reduction <add>, %29, %cst_26 [1] : vector<2x1x8x128xf32> to vector<2x8x128xf32>
    %31 = arith.addf %28, %30 : vector<2x8x128xf32>
    %c0_27 = arith.constant 0 : index
    %c0_28 = arith.constant 0 : index
    %c0_29 = arith.constant 0 : index
    %32 = vector.load %arg7[%c0_27, %c0_28, %c0_29] : memref<2x8x128xf32, #tpu.memory_space<vmem>>, vector<2x8x128xf32>
    tpu.vector_store %arg7[%c0_27, %c0_28, %c0_29], %31 {strides = array<i32>} : memref<2x8x128xf32, #tpu.memory_space<vmem>>, vector<2x8x128xf32>,
    %c0_i32_30 = arith.constant 0 : i32
    %33 = arith.cmpi eq, %arg1, %c0_i32_30 : i32
    %34 = arith.extui %33 : i1 to i32
    %c0_i32_31 = arith.constant 0 : i32
    %35 = arith.cmpi ne, %34, %c0_i32_31 : i32
    scf.if %35 {
      %c0_32 = arith.constant 0 : index
      %c0_33 = arith.constant 0 : index
      %c0_34 = arith.constant 0 : index
      %36 = vector.load %arg5[%c0_32, %c0_33, %c0_34] : memref<2x8x128xf32, #tpu.memory_space<vmem>>, vector<2x8x128xf32>
      %cst_35 = arith.constant dense<0.000000e+00> : vector<2x8xf32>
      %37 = vector.multi_reduction <add>, %36, %cst_35 [2] : vector<2x8x128xf32> to vector<2x8xf32>
      %38 = vector.shape_cast %37 : vector<2x8xf32> to vector<2x8x1xf32>
      %cst_36 = arith.constant dense<0.000000e+00> : vector<2x1xf32>
      %39 = vector.multi_reduction <add>, %38, %cst_36 [1] : vector<2x8x1xf32> to vector<2x1xf32>
      %40 = vector.shape_cast %39 : vector<2x1xf32> to vector<2x1x1xf32>
      %c0_37 = arith.constant 0 : index
      %c0_38 = arith.constant 0 : index
      %c0_39 = arith.constant 0 : index
      %41 = vector.load %arg6[%c0_37, %c0_38, %c0_39] : memref<2x8x128xf32, #tpu.memory_space<vmem>>, vector<2x8x128xf32>
      %cst_40 = arith.constant dense<0.000000e+00> : vector<2x8xf32>
      %42 = vector.multi_reduction <add>, %41, %cst_40 [2] : vector<2x8x128xf32> to vector<2x8xf32>
      %43 = vector.shape_cast %42 : vector<2x8xf32> to vector<2x8x1xf32>
      %cst_41 = arith.constant dense<0.000000e+00> : vector<2x1xf32>
      %44 = vector.multi_reduction <add>, %43, %cst_41 [1] : vector<2x8x1xf32> to vector<2x1xf32>
      %45 = vector.shape_cast %44 : vector<2x1xf32> to vector<2x1x1xf32>
      %c0_42 = arith.constant 0 : index
      %c0_43 = arith.constant 0 : index
      %c0_44 = arith.constant 0 : index
      %46 = vector.load %arg7[%c0_42, %c0_43, %c0_44] : memref<2x8x128xf32, #tpu.memory_space<vmem>>, vector<2x8x128xf32>
      %cst_45 = arith.constant dense<0.000000e+00> : vector<2x8xf32>
      %47 = vector.multi_reduction <add>, %46, %cst_45 [2] : vector<2x8x128xf32> to vector<2x8xf32>
      %48 = vector.shape_cast %47 : vector<2x8xf32> to vector<2x8x1xf32>
      %cst_46 = arith.constant dense<0.000000e+00> : vector<2x1xf32>
      %49 = vector.multi_reduction <add>, %48, %cst_46 [1] : vector<2x8x1xf32> to vector<2x1xf32>
      %50 = vector.shape_cast %49 : vector<2x1xf32> to vector<2x1x1xf32>
      %cst_47 = arith.constant 0.000000e+00 : f32
      %51 = vector.broadcast %cst_47 : f32 to vector<2x1x1xf32>
      %52 = arith.subf %51, %40 : vector<2x1x1xf32>
      %cst_48 = arith.constant 2.048000e+03 : f32
      %53 = vector.broadcast %cst_48 : f32 to vector<2x1x1xf32>
      %54 = arith.divf %52, %53 : vector<2x1x1xf32>
      %cst_49 = arith.constant 2.000000e+00 : f32
      %55 = vector.broadcast %cst_49 : f32 to vector<2x1x1xf32>
      %56 = arith.mulf %55, %45 : vector<2x1x1xf32>
      %cst_50 = arith.constant 9.99999997E-7 : f32
      %57 = vector.broadcast %cst_50 : f32 to vector<2x1x1xf32>
      %58 = arith.addf %56, %57 : vector<2x1x1xf32>
      %cst_51 = arith.constant 9.99999997E-7 : f32
      %59 = vector.broadcast %cst_51 : f32 to vector<2x1x1xf32>
      %60 = arith.addf %50, %59 : vector<2x1x1xf32>
      %61 = arith.divf %58, %60 : vector<2x1x1xf32>
      %cst_52 = arith.constant 1.000000e+00 : f32
      %62 = vector.broadcast %cst_52 : f32 to vector<2x1x1xf32>
      %63 = arith.subf %62, %61 : vector<2x1x1xf32>
      %cst_53 = arith.constant 1.000000e+00 : f32
      %64 = vector.broadcast %cst_53 : f32 to vector<2x1x1xf32>
      %65 = arith.mulf %64, %54 : vector<2x1x1xf32>
      %cst_54 = arith.constant 1.000000e+00 : f32
      %66 = vector.broadcast %cst_54 : f32 to vector<2x1x1xf32>
      %67 = arith.mulf %66, %63 : vector<2x1x1xf32>
      %68 = arith.addf %65, %67 : vector<2x1x1xf32>
      %cst_55 = arith.constant 2.000000e+00 : f32
      %69 = vector.broadcast %cst_55 : f32 to vector<2x1x1xf32>
      %70 = arith.divf %68, %69 : vector<2x1x1xf32>
      %71 = vector.shape_cast %70 : vector<2x1x1xf32> to vector<2x1x1xf32>
      %72 = vector.broadcast %71 : vector<2x1x1xf32> to vector<2x8x128xf32>
      %c0_56 = arith.constant 0 : index
      %c0_57 = arith.constant 0 : index
      %c0_58 = arith.constant 0 : index
      %73 = vector.load %arg4[%c0_56, %c0_57, %c0_58] : memref<2x8x128xf32, #tpu.memory_space<vmem>>, vector<2x8x128xf32>
      tpu.vector_store %arg4[%c0_56, %c0_57, %c0_58], %72 {strides = array<i32>} : memref<2x8x128xf32, #tpu.memory_space<vmem>>, vector<2x8x128xf32>,
    } else {
    }
    return
  }
  func.func @transform_0(%arg0: i32, %arg1: i32) -> (i32, i32, i32) {
    %c0_i32 = arith.constant 0 : i32
    %c0_i32_0 = arith.constant 0 : i32
    return %arg0, %arg1, %c0_i32 : i32, i32, i32
  }
  func.func @transform_1(%arg0: i32, %arg1: i32) -> (i32, i32, i32) {
    %c0_i32 = arith.constant 0 : i32
    %c0_i32_0 = arith.constant 0 : i32
    return %arg0, %arg1, %c0_i32 : i32, i32, i32
  }
  func.func @transform_2(%arg0: i32, %arg1: i32) -> (i32, i32, i32) {
    %c0_i32 = arith.constant 0 : i32
    %c0_i32_0 = arith.constant 0 : i32
    %c0_i32_1 = arith.constant 0 : i32
    return %arg0, %c0_i32, %c0_i32_0 : i32, i32, i32
  }
}

</mosaic_0001>

<bundles_post_ra>
// kernel: tpu_custom_call.1
= control target key start
LH: loop header
LB: loop body
LE: loop exit
PB: predicated region body
PF: predicated region fallthrough
CT: control target
= control target key end

     0   :  { %7 = vsyncpa [#allocation6], 0  ;;  %s347_s0 = inlined_call_operand.hbm [shape: f32[2,8,128], index: 0, kind: input, shape index: {}]   ;;  %s348_s1 = inlined_call_operand.hbm [shape: f32[2,8,128], index: 1, kind: input, shape index: {}]   ;;  %s349_s2 = inlined_call_operand.hbm [shape: f32[2,8,128], index: 2, kind: output, shape index: {}]  }
   0x1   :  { %8 = vsyncpa [#allocation9], 0 }
   0x2   :  { %9 = vsyncpa [#allocation7], 0  ;;  %s282_s9 = smov [#allocation5]   ;;  %s210_s13 = scalar_lea.hbm %s347_s0, 256 }
   0x3   :  { %s15_s10 = sshll.u32 %s282_s9, 4  ;;  %p211_p0 = scmp.ne.s32.totalorder %s347_s0, %s210_s13  ;;  %s16_s10 = int_to_ptr.vmem [resolvable:$true] %s15_s10 }
   0x4   :  { %p214_p1 = scmp.lt.u32.totalorder %s210_s13, %s347_s0 }
   0x6   :  { %p216_p2 = pnand %p214_p1, %p211_p0 }
   0x8   :  { %219 = shalt.err (!%p216_p2)
}
   0x9   :  { %s220_s18 = scalar_lea.vmem %s16_s10, 256  ;;  %p225_p4 = scmp.lt.s32.totalorder %s16_s10, %s16_s10 }
   0xa   :  { %p221_p3 = scmp.ne.s32.totalorder %s16_s10, %s220_s18  ;;  %p226_p5 = scmp.lt.s32.totalorder %s220_s18, %s220_s18 }
   0xc   :  { %p227_p6 = por %p226_p5, %p225_p4 }
   0xe   :  { %p228_p7 = pnand %p227_p6, %p221_p3 }
  0x10   :  { %231 = shalt.err (!%p228_p7)
}
  0x11   :  { %s283_s19 = smov 128   ;;  %s284_s20 = smov 8  }
  0x12   :  { %21 = dma.hbm_to_vmem [thread:$0]  %s347_s0, 256, %s16_s10, [#allocation6], %s283_s19, %s283_s19, %s284_s20  }
  0x13   :  { %s285_s23 = smov [#allocation8]   ;;  %s232_s27 = scalar_lea.hbm %s348_s1, 256 }
  0x14   :  { %s27_s24 = sshll.u32 %s285_s23, 4  ;;  %p233_p8 = scmp.ne.s32.totalorder %s348_s1, %s232_s27  ;;  %s28_s24 = int_to_ptr.vmem [resolvable:$true] %s27_s24 }
  0x15   :  { %p236_p9 = scmp.lt.u32.totalorder %s232_s27, %s348_s1 }
  0x17   :  { %p238_p10 = pnand %p236_p9, %p233_p8 }
  0x19   :  { %241 = shalt.err (!%p238_p10)
}
  0x1a   :  { %s242_s4 = scalar_lea.vmem %s28_s24, 256  ;;  %p247_p12 = scmp.lt.s32.totalorder %s28_s24, %s28_s24 }
  0x1b   :  { %p243_p11 = scmp.ne.s32.totalorder %s28_s24, %s242_s4  ;;  %p248_p13 = scmp.lt.s32.totalorder %s242_s4, %s242_s4 }
  0x1d   :  { %p249_p0 = por %p248_p13, %p247_p12 }
  0x1f   :  { %p250_p1 = pnand %p249_p0, %p243_p11 }
  0x21   :  { %253 = shalt.err (!%p250_p1)
}
  0x22   :  { %33 = dma.hbm_to_vmem [thread:$0]  %s348_s1, 256, %s28_s24, [#allocation9], %s283_s19, %s283_s19, %s284_s20  }
  0x23   :  { %276 = dma.done.wait [#allocation6], 256  }
  0x24   :  { %277 = vsyncadd [#allocation6], 4294967040 }
  0x25   :  { %278 = dma.done.wait [#allocation9], 256  }
  0x26   :  { %279 = vsyncadd [#allocation9], 4294967040  ;;  %v50_v0 = vld [vmem:[#allocation5] sm:$0xff]  ;;  %v52_v1 = vld [vmem:[#allocation8] sm:$0xff]  ;;  %s286_s1 = smov [#allocation10]  }
  0x27   :  { %v51_v2 = vld [vmem:[#allocation5 + $0x8] sm:$0xff]  ;;  %v68_v3 = vmul.f32 %v50_v0, %v50_v0  ;;  %v54_v4 = vmax.f32 %v50_v0, 1e-08  ;;  %v82_v5 = vmul.f32 %v52_v1, %v50_v0  ;;  %v53_v6 = vld [vmem:[#allocation8 + $0x8] sm:$0xff]  ;;  %vm56_vm0 = vcmp.ne.f32.partialorder %v52_v1, 0.0  ;;  %s184_s6 = sshll.u32 %s286_s1, 4  ;;  %s185_s6 = int_to_ptr.vmem [resolvable:$true] %s184_s6 }
  0x28   :  { %v55_v7 = vmax.f32 %v51_v2, 1e-08  ;;  %v69_v8 = vmul.f32 %v51_v2, %v51_v2  ;;  %vm57_vm1 = vcmp.ne.f32.partialorder %v53_v6, 0.0  ;;  %v83_v11 = vmul.f32 %v53_v6, %v51_v2  ;;  %s254_s7 = scalar_lea.vmem %s185_s6, 256  ;;  %p259_p3 = scmp.lt.s32.totalorder %s185_s6, %s185_s6 }
  0x29   :  { %v70_v9 = vadd.f32 %v68_v3, %v52_v1  ;;  %v58_v10 = vsub.f32 1.0, %v54_v4  ;;  %121 = vadd.xlane.f32.xlu1 %v82_v5  ;;  %p255_p2 = scmp.ne.s32.totalorder %s185_s6, %s254_s7  ;;  %p260_p4 = scmp.lt.s32.totalorder %s254_s7, %s254_s7 }
  0x2a   :  { %v59_v12 = vsub.f32 1.0, %v55_v7  ;;  %v71_v13 = vadd.f32 %v69_v8, %v53_v6 }
  0x2b   :  { %139 = vadd.xlane.f32.xlu0 %v70_v9  ;;  %v60_v14 = vsel %vm56_vm0, %v54_v4, %v58_v10  ;;  %p261_p5 = por %p260_p4, %p259_p3 }
  0x2c   :  { %v61_v15 = vsel %vm57_vm1, %v55_v7, %v59_v12  ;;  %v62_v16 = vadd.f32 1e-08, %v60_v14 }
  0x2d   :  { %123 = vadd.xlane.f32.xlu1 %v83_v11  ;;  %v63_v17 = vadd.f32 1e-08, %v61_v15  ;;  %p262_p6 = pnand %p261_p5, %p255_p2 }
  0x2e   :  { %202 = vlog2.f32 %v62_v16 }
  0x2f   :  { %141 = vadd.xlane.f32.xlu0 %v71_v13  ;;  %204 = vlog2.f32 %v63_v17 }
  0x38   :  { %v203_v18 = vpop.eup %202 }
  0x39   :  { %v205_v19 = vpop.eup %204  ;;  %v65_v20 = vmul.f32 0.6931472, %v203_v18 }
  0x3a   :  { %v67_v21 = vmul.f32 0.6931472, %v205_v19 }
  0x3b   :  { %103 = vadd.xlane.f32.xlu0 %v65_v20 }
  0x3c   :  { %105 = vadd.xlane.f32.xlu1 %v67_v21 }
  0xb6   :  { %v122_v22 = vpop.xlane.xlu1 %121 }
  0xb7   :  { %v125_v23 = vrot.slane %v122_v22, 4 }
  0xb8   :  { %v140_v24 = vpop.xlane.xlu0 %139 }
  0xb9   :  { %v143_v25 = vrot.slane %v140_v24, 4  ;;  %v126_v26 = vadd.f32 %v125_v23, %v122_v22 }
  0xba   :  { %v124_v27 = vpop.xlane.xlu1 %123 }
  0xbb   :  { %v144_v28 = vadd.f32 %v143_v25, %v140_v24  ;;  %v131_v29 = vrot.slane %v124_v27, 4  ;;  %v127_v32 = vrot.slane %v126_v26, 2 }
  0xbc   :  { %v142_v30 = vpop.xlane.xlu0 %141 }
  0xbd   :  { %v145_v31 = vrot.slane %v144_v28, 2  ;;  %v149_v33 = vrot.slane %v142_v30, 4  ;;  %v132_v34 = vadd.f32 %v131_v29, %v124_v27  ;;  %v128_v39 = vadd.f32 %v127_v32, %v126_v26 }
  0xbf   :  { %v146_v35 = vadd.f32 %v145_v31, %v144_v28  ;;  %v150_v36 = vadd.f32 %v149_v33, %v142_v30  ;;  %v133_v37 = vrot.slane %v132_v34, 2  ;;  %v129_v45 = vrot.slane %v128_v39, 1 }
  0xc1   :  { %v147_v38 = vrot.slane %v146_v35, 1  ;;  %v151_v40 = vrot.slane %v150_v36, 2  ;;  %v134_v43 = vadd.f32 %v133_v37, %v132_v34  ;;  %v130_v50 = vadd.f32 %v129_v45, %v128_v39 }
  0xc3   :  { %v148_v41 = vadd.f32 %v147_v38, %v146_v35  ;;  %v152_v42 = vadd.f32 %v151_v40, %v150_v36  ;;  %v135_v48 = vrot.slane %v134_v43, 1  ;;  %v160_v58 = vmul.f32 2.0, %v130_v50 }
  0xc5   :  { %v164_v44 = vadd.f32 1e-06, %v148_v41  ;;  %v153_v46 = vrot.slane %v152_v42, 1  ;;  %v136_v56 = vadd.f32 %v135_v48, %v134_v43  ;;  %v162_v1 = vadd.f32 1e-06, %v160_v58 }
  0xc7   :  { %206 = vrcp.f32 %v164_v44  ;;  %v154_v47 = vadd.f32 %v153_v46, %v152_v42  ;;  %v161_v62 = vmul.f32 2.0, %v136_v56 }
  0xc8   :  { %v104_v49 = vpop.xlane.xlu0 %103 }
  0xc9   :  { %v165_v51 = vadd.f32 1e-06, %v154_v47  ;;  %v106_v52 = vpop.xlane.xlu1 %105  ;;  %v107_v53 = vrot.slane %v104_v49, 4  ;;  %v163_v6 = vadd.f32 1e-06, %v161_v62 }
  0xca   :  { %v113_v54 = vrot.slane %v106_v52, 4 }
  0xcb   :  { %208 = vrcp.f32 %v165_v51  ;;  %v108_v55 = vadd.f32 %v107_v53, %v104_v49 }
  0xcc   :  { %v114_v57 = vadd.f32 %v113_v54, %v106_v52 }
  0xcd   :  { %v109_v59 = vrot.slane %v108_v55, 2 }
  0xce   :  { %v115_v60 = vrot.slane %v114_v57, 2 }
  0xcf   :  { %v110_v61 = vadd.f32 %v109_v59, %v108_v55 }
  0xd0   :  { %v116_v63 = vadd.f32 %v115_v60, %v114_v57 }
  0xd1   :  { %v207_v0 = vpop.eup %206  ;;  %v111_v2 = vrot.slane %v110_v61, 1 }
  0xd2   :  { %v117_v3 = vrot.slane %v116_v63, 1  ;;  %v167_v5 = vmul.f32 %v207_v0, %v162_v1 }
  0xd3   :  { %v112_v4 = vadd.f32 %v111_v2, %v110_v61 }
  0xd4   :  { %v118_v7 = vadd.f32 %v117_v3, %v116_v63  ;;  %v170_v13 = vsub.f32 1.0, %v167_v5 }
  0xd5   :  { %v209_v8 = vpop.eup %208  ;;  %v155_v9 = vsub.f32 0.0, %v112_v4 }
  0xd6   :  { %v156_v10 = vsub.f32 0.0, %v118_v7  ;;  %v169_v11 = vmul.f32 %v209_v8, %v163_v6 }
  0xd7   :  { %v158_v12 = vmul.f32 0.00048828125, %v155_v9 }
  0xd8   :  { %v159_v14 = vmul.f32 0.00048828125, %v156_v10  ;;  %v171_v15 = vsub.f32 1.0, %v169_v11 }
  0xd9   :  { %v172_v16 = vadd.f32 %v170_v13, %v158_v12 }
  0xda   :  { %v173_v17 = vadd.f32 %v171_v15, %v159_v14 }
  0xdb   :  { %v175_v18 = vmul.f32 0.5, %v172_v16 }
  0xdc   :  { %v176_v19 = vmul.f32 0.5, %v173_v17 }
  0xdd   :  { %177 = vst [vmem:[#allocation10] sm:$0xff] %v175_v18 }
  0xde   :  { %178 = vst [vmem:[#allocation10 + $0x8] sm:$0xff] %v176_v19 }
  0xdf   :  { %265 = shalt.err (!%p262_p6)
}
  0xe0   :  { %s266_s10 = scalar_lea.hbm %s349_s2, 256 }
  0xe1   :  { %p267_p7 = scmp.ne.s32.totalorder %s349_s2, %s266_s10  ;;  %p270_p8 = scmp.lt.u32.totalorder %s266_s10, %s349_s2 }
  0xe3   :  { %p272_p9 = pnand %p270_p8, %p267_p7 }
  0xe5   :  { %275 = shalt.err (!%p272_p9)
}
  0xe6   :  { %190 = dma.vmem_to_hbm [thread:$0]  %s185_s6, 256, %s349_s2, [#allocation7], %s283_s19, %s283_s19, %s284_s20  }
  0xe7   :  { %280 = dma.done.wait [#allocation7], 256  }
  0xe8   :  { %281 = vsyncadd [#allocation7], 4294967040 }
  0xe9   :  { %194 = vsyncpa [#allocation6], 1 }
  0xea   :  { %195 = vsyncpa [#allocation9], 1 }
  0xeb   :  { %196 = vsyncpa [#allocation7], 1 }

</bundles_post_ra>
